<compile_context>
chip_gen: v5e
topology: v5e:2x2
jax: 0.10.0
libtpu: 0.0.40
codegen_flags: <defaults>
</compile_context>

<pallas_src>
import jax
import jax.numpy as jnp
from jax.experimental import pallas as pl
from jax.experimental.pallas import tpu as pltpu


def _round_up(x, m):
    return (x + m - 1) // m * m


def critic_kernel(s_ref, a_ref, w1s_ref, w1a_ref, b1_ref, w2_ref, b2_ref,
                  w3_ref, b3_ref, out_ref):
    # s_ref: (TB, S)  a_ref: (TB, A)
    # w1s_ref: (S, 2*H0)  w1a_ref: (A, 2*H0)  b1_ref: (1, 2*H0)
    # w2_ref: (2*H0, 2*H1) block-diagonal      b2_ref: (1, 2*H1)
    # w3_ref: (2*H1, 128) (only lanes 0/1 used) b3_ref: (1, 128)
    # out_ref: (2, TB)  -- batch on the lane axis (lane-dense store)

    # Layer 1: fused "concat" -> split contraction over state/action halves.
    h1 = jnp.dot(s_ref[...], w1s_ref[...], preferred_element_type=jnp.float32)
    h1 = h1 + jnp.dot(a_ref[...], w1a_ref[...], preferred_element_type=jnp.float32)
    h1 = jnp.maximum(h1 + b1_ref[...], 0.0)

    # Layer 2 (both heads at once via block-diagonal weights).
    h2 = jnp.dot(h1, w2_ref[...], preferred_element_type=jnp.float32) + b2_ref[...]
    h2 = jnp.maximum(h2, 0.0)

    # Layer 3, padded to 128 output lanes so the transpose below is
    # (8,128)-tile aligned; lane 0 = Q1, lane 1 = Q2, the rest are exact zeros.
    q_wide = jnp.dot(h2, w3_ref[...], preferred_element_type=jnp.float32) + b3_ref[...]

    # Lane-dense epilogue: (TB, 128) -> (128, TB), keep the two real rows.
    q_t = q_wide.T
    out_ref[...] = q_t[0:2, :].astype(out_ref.dtype)


def critic_forward(states, actions, params, *, block_b=512):
    """Returns (q1, q2), each (B, 1) f32 — matches Critic.forward."""
    B, S = states.shape
    A = actions.shape[1]
    w1_s, w1_a, b1, w2, b2, w3w, b3w = params
    H0x2 = w2.shape[0]
    H1x2 = w2.shape[1]
    NW = w3w.shape[1]  # padded lane width of the last layer (128)

    assert block_b % 128 == 0
    # Batch tile must be a multiple of 128 so the (2, TB) output block is
    # lane-dense and the in-kernel transpose is tile-aligned.  Pad batch up
    # if needed (no-op for aligned batches) and slice the padding off at the end.
    tb = min(block_b, _round_up(B, 128))
    bp = _round_up(B, tb)
    if bp != B:
        pad = bp - B
        states = jnp.pad(states, ((0, pad), (0, 0)))
        actions = jnp.pad(actions, ((0, pad), (0, 0)))
    n_tiles = bp // tb

    out = pl.pallas_call(
        critic_kernel,
        out_shape=jax.ShapeDtypeStruct((2, bp), jnp.float32),
        grid_spec=pl.GridSpec(
            grid=(n_tiles,),
            in_specs=[
                pl.BlockSpec((tb, S), lambda i: (i, 0)),     # states tile
                pl.BlockSpec((tb, A), lambda i: (i, 0)),     # actions tile
                pl.BlockSpec((S, H0x2), lambda i: (0, 0)),   # weights: VMEM-resident,
                pl.BlockSpec((A, H0x2), lambda i: (0, 0)),   # DMA'd once (same block
                pl.BlockSpec((1, H0x2), lambda i: (0, 0)),   # index every step)
                pl.BlockSpec((H0x2, H1x2), lambda i: (0, 0)),
                pl.BlockSpec((1, H1x2), lambda i: (0, 0)),
                pl.BlockSpec((H1x2, NW), lambda i: (0, 0)),
                pl.BlockSpec((1, NW), lambda i: (0, 0)),
            ],
            out_specs=pl.BlockSpec((2, tb), lambda i: (0, i)),
        ),
        compiler_params=pltpu.CompilerParams(
            # Batch tiles are independent -> shard across TensorCores on v7x.
            dimension_semantics=("parallel",),
        ),
    )(states, actions, w1_s, w1_a, b1, w2, b2, w3w, b3w)

    q1 = out[0, :B][:, None]
    q2 = out[1, :B][:, None]
    return q1, q2


def init_params(key, state_dim, action_dim, hidden_dim):
    """Per-head deterministic init (uniform, PyTorch-Linear-style bounds)."""
    D = state_dim + action_dim
    H0, H1 = hidden_dim

    def linear(k, fan_in, fan_out):
        kw, kb = jax.random.split(k)
        bound = 1.0 / jnp.sqrt(fan_in)
        w = jax.random.uniform(kw, (fan_in, fan_out), jnp.float32, -bound, bound)
        b = jax.random.uniform(kb, (fan_out,), jnp.float32, -bound, bound)
        return w, b

    keys = jax.random.split(key, 6)
    heads = []
    for h in range(2):
        w1, b1 = linear(keys[3 * h + 0], D, H0)
        w2, b2 = linear(keys[3 * h + 1], H0, H1)
        w3, b3 = linear(keys[3 * h + 2], H1, 1)
        heads.append((w1, b1, w2, b2, w3, b3))
    return tuple(heads)


def pack_params(heads, state_dim, lane_pad=128):
    """Fuse both Q heads into wide / block-diagonal weights for the kernel."""
    (w1a_, b1a, w2a, b2a, w3a, b3a), (w1b_, b1b, w2b, b2b, w3b, b3b) = heads
    H0 = w1a_.shape[1]
    H1 = w2a.shape[1]

    # Layer 1: concat heads along the output-feature axis, pre-split by input.
    w1 = jnp.concatenate([w1a_, w1b_], axis=1)          # (D, 2*H0)
    w1_s = w1[:state_dim]                               # (S, 2*H0)
    w1_a = w1[state_dim:]                               # (A, 2*H0)
    b1 = jnp.concatenate([b1a, b1b])[None, :]           # (1, 2*H0)

    # Layer 2: block-diagonal so the heads stay independent.
    w2 = jnp.zeros((2 * H0, 2 * H1), jnp.float32)
    w2 = w2.at[:H0, :H1].set(w2a).at[H0:, H1:].set(w2b)
    b2 = jnp.concatenate([b2a, b2b])[None, :]           # (1, 2*H1)

    # Layer 3: block-diagonal, padded to `lane_pad` output lanes
    # (lane 0 = Q1, lane 1 = Q2) for the aligned lane-dense epilogue.
    w3 = jnp.zeros((2 * H1, lane_pad), jnp.float32)
    w3 = w3.at[:H1, 0].set(w3a[:, 0]).at[H1:, 1].set(w3b[:, 0])
    b3 = jnp.zeros((1, lane_pad), jnp.float32)
    b3 = b3.at[0, 0].set(b3a[0]).at[0, 1].set(b3b[0])

    return (w1_s, w1_a, b1, w2, b2, w3, b3)


def critic_ref(states, actions, heads):
    """Pure-JAX per-head reference (mirrors the PyTorch module exactly)."""
    x = jnp.concatenate([states, actions], axis=1)
    outs = []
    for (w1, b1, w2, b2, w3, b3) in heads:
        h1 = jnp.maximum(x @ w1 + b1, 0.0)
        h2 = jnp.maximum(h1 @ w2 + b2, 0.0)
        outs.append(h2 @ w3 + b3)
    return outs[0], outs[1]


if __name__ == "__main__":
    key = jax.random.PRNGKey(0)
    k_params, k_s, k_a = jax.random.split(key, 3)

    batch = 512
    state_dim = 12
    action_dim = 4
    hidden_dim = (32, 32)

    heads = init_params(k_params, state_dim, action_dim, hidden_dim)
    params = pack_params(heads, state_dim)

    states = jax.random.normal(k_s, (batch, state_dim), jnp.float32)
    actions = jax.random.normal(k_a, (batch, action_dim), jnp.float32)

    # block_b=256 -> two batch tiles, exercising the tiled/parallel grid path.
    q1, q2 = critic_forward(states, actions, params, block_b=256)
    q1 = jax.block_until_ready(q1)
    q2 = jax.block_until_ready(q2)

    r1, r2 = critic_ref(states, actions, heads)
    assert q1.shape == (batch, 1) and q2.shape == (batch, 1)
    assert jnp.allclose(q1, r1, atol=1e-4, rtol=1e-4), float(jnp.max(jnp.abs(q1 - r1)))
    assert jnp.allclose(q2, r2, atol=1e-4, rtol=1e-4), float(jnp.max(jnp.abs(q2 - r2)))

    print("KERNEL_OK")
</pallas_src>

<mosaic_0001>
module attributes {stable_mosaic.version = 11 : i64} {
  func.func @critic_kernel(%arg0: i32, %arg1: memref<256x12xf32, #tpu.memory_space<vmem>>, %arg2: memref<256x4xf32, #tpu.memory_space<vmem>>, %arg3: memref<12x64xf32, #tpu.memory_space<vmem>>, %arg4: memref<4x64xf32, #tpu.memory_space<vmem>>, %arg5: memref<1x64xf32, #tpu.memory_space<vmem>>, %arg6: memref<64x64xf32, #tpu.memory_space<vmem>>, %arg7: memref<1x64xf32, #tpu.memory_space<vmem>>, %arg8: memref<64x128xf32, #tpu.memory_space<vmem>>, %arg9: memref<1x128xf32, #tpu.memory_space<vmem>>, %arg10: memref<2x256xf32, #tpu.memory_space<vmem>>) attributes {dimension_semantics = [#tpu.dimension_semantics<parallel>], iteration_bounds = array<i64: 2>, scalar_prefetch = 0 : i64, scratch_operands = 0 : i64, tpu.core_type = #tpu.core_type<tc>, window_params = [{transform_indices = @transform_0, window_bounds = array<i64: 256, 12>}, {transform_indices = @transform_1, window_bounds = array<i64: 256, 4>}, {pipeline_mode = #tpu.pipeline_mode<synchronous>, transform_indices = @transform_2, window_bounds = array<i64: 12, 64>}, {pipeline_mode = #tpu.pipeline_mode<synchronous>, transform_indices = @transform_3, window_bounds = array<i64: 4, 64>}, {pipeline_mode = #tpu.pipeline_mode<synchronous>, transform_indices = @transform_4, window_bounds = array<i64: 1, 64>}, {pipeline_mode = #tpu.pipeline_mode<synchronous>, transform_indices = @transform_5, window_bounds = array<i64: 64, 64>}, {pipeline_mode = #tpu.pipeline_mode<synchronous>, transform_indices = @transform_6, window_bounds = array<i64: 1, 64>}, {pipeline_mode = #tpu.pipeline_mode<synchronous>, transform_indices = @transform_7, window_bounds = array<i64: 64, 128>}, {pipeline_mode = #tpu.pipeline_mode<synchronous>, transform_indices = @transform_8, window_bounds = array<i64: 1, 128>}, {transform_indices = @transform_9, window_bounds = array<i64: 2, 256>}]} {
    %c0 = arith.constant 0 : index
    %c0_0 = arith.constant 0 : index
    %0 = vector.load %arg1[%c0, %c0_0] : memref<256x12xf32, #tpu.memory_space<vmem>>, vector<256x12xf32>
    %c0_1 = arith.constant 0 : index
    %c0_2 = arith.constant 0 : index
    %1 = vector.load %arg3[%c0_1, %c0_2] : memref<12x64xf32, #tpu.memory_space<vmem>>, vector<12x64xf32>
    %cst = arith.constant dense<0.000000e+00> : vector<256x64xf32>
    %2 = tpu.matmul %0, %1, %cst {dimension_numbers = #tpu.dot_dimension_numbers<[1], [0], [0], [1], [0, 0, 1, 1], [], []>} : vector<256x12xf32>, vector<12x64xf32>, vector<256x64xf32> -> vector<256x64xf32>
    %c0_3 = arith.constant 0 : index
    %c0_4 = arith.constant 0 : index
    %3 = vector.load %arg2[%c0_3, %c0_4] : memref<256x4xf32, #tpu.memory_space<vmem>>, vector<256x4xf32>
    %c0_5 = arith.constant 0 : index
    %c0_6 = arith.constant 0 : index
    %4 = vector.load %arg4[%c0_5, %c0_6] : memref<4x64xf32, #tpu.memory_space<vmem>>, vector<4x64xf32>
    %cst_7 = arith.constant dense<0.000000e+00> : vector<256x64xf32>
    %5 = tpu.matmul %3, %4, %cst_7 {dimension_numbers = #tpu.dot_dimension_numbers<[1], [0], [0], [1], [0, 0, 1, 1], [], []>} : vector<256x4xf32>, vector<4x64xf32>, vector<256x64xf32> -> vector<256x64xf32>
    %6 = arith.addf %2, %5 : vector<256x64xf32>
    %c0_8 = arith.constant 0 : index
    %c0_9 = arith.constant 0 : index
    %7 = vector.load %arg5[%c0_8, %c0_9] : memref<1x64xf32, #tpu.memory_space<vmem>>, vector<1x64xf32>
    %8 = vector.broadcast %7 : vector<1x64xf32> to vector<256x64xf32>
    %9 = arith.addf %6, %8 : vector<256x64xf32>
    %cst_10 = arith.constant 0.000000e+00 : f32
    %10 = vector.broadcast %cst_10 : f32 to vector<256x64xf32>
    %11 = arith.maximumf %9, %10 : vector<256x64xf32>
    %c0_11 = arith.constant 0 : index
    %c0_12 = arith.constant 0 : index
    %12 = vector.load %arg6[%c0_11, %c0_12] : memref<64x64xf32, #tpu.memory_space<vmem>>, vector<64x64xf32>
    %cst_13 = arith.constant dense<0.000000e+00> : vector<256x64xf32>
    %13 = tpu.matmul %11, %12, %cst_13 {dimension_numbers = #tpu.dot_dimension_numbers<[1], [0], [0], [1], [0, 0, 1, 1], [], []>} : vector<256x64xf32>, vector<64x64xf32>, vector<256x64xf32> -> vector<256x64xf32>
    %c0_14 = arith.constant 0 : index
    %c0_15 = arith.constant 0 : index
    %14 = vector.load %arg7[%c0_14, %c0_15] : memref<1x64xf32, #tpu.memory_space<vmem>>, vector<1x64xf32>
    %15 = vector.broadcast %14 : vector<1x64xf32> to vector<256x64xf32>
    %16 = arith.addf %13, %15 : vector<256x64xf32>
    %cst_16 = arith.constant 0.000000e+00 : f32
    %17 = vector.broadcast %cst_16 : f32 to vector<256x64xf32>
    %18 = arith.maximumf %16, %17 : vector<256x64xf32>
    %c0_17 = arith.constant 0 : index
    %c0_18 = arith.constant 0 : index
    %19 = vector.load %arg8[%c0_17, %c0_18] : memref<64x128xf32, #tpu.memory_space<vmem>>, vector<64x128xf32>
    %cst_19 = arith.constant dense<0.000000e+00> : vector<256x128xf32>
    %20 = tpu.matmul %18, %19, %cst_19 {dimension_numbers = #tpu.dot_dimension_numbers<[1], [0], [0], [1], [0, 0, 1, 1], [], []>} : vector<256x64xf32>, vector<64x128xf32>, vector<256x128xf32> -> vector<256x128xf32>
    %c0_20 = arith.constant 0 : index
    %c0_21 = arith.constant 0 : index
    %21 = vector.load %arg9[%c0_20, %c0_21] : memref<1x128xf32, #tpu.memory_space<vmem>>, vector<1x128xf32>
    %22 = vector.broadcast %21 : vector<1x128xf32> to vector<256x128xf32>
    %23 = arith.addf %20, %22 : vector<256x128xf32>
    %24 = tpu.transpose %23, [1, 0] : vector<256x128xf32> -> vector<128x256xf32>
    %25 = vector.extract_strided_slice %24 {offsets = [0, 0], sizes = [2, 256], strides = [1, 1]} : vector<128x256xf32> to vector<2x256xf32>
    %c0_22 = arith.constant 0 : index
    %c0_23 = arith.constant 0 : index
    %26 = vector.load %arg10[%c0_22, %c0_23] : memref<2x256xf32, #tpu.memory_space<vmem>>, vector<2x256xf32>
    tpu.vector_store %arg10[%c0_22, %c0_23], %25 {strides = array<i32>} : memref<2x256xf32, #tpu.memory_space<vmem>>, vector<2x256xf32>,
    return
  }
  func.func @transform_0(%arg0: i32) -> (i32, i32) {
    %c0_i32 = arith.constant 0 : i32
    %c0_i32_0 = arith.constant 0 : i32
    return %arg0, %c0_i32 : i32, i32
  }
  func.func @transform_1(%arg0: i32) -> (i32, i32) {
    %c0_i32 = arith.constant 0 : i32
    %c0_i32_0 = arith.constant 0 : i32
    return %arg0, %c0_i32 : i32, i32
  }
  func.func @transform_2(%arg0: i32) -> (i32, i32) {
    %c0_i32 = arith.constant 0 : i32
    %c0_i32_0 = arith.constant 0 : i32
    %c0_i32_1 = arith.constant 0 : i32
    return %c0_i32, %c0_i32_0 : i32, i32
  }
  func.func @transform_3(%arg0: i32) -> (i32, i32) {
    %c0_i32 = arith.constant 0 : i32
    %c0_i32_0 = arith.constant 0 : i32
    %c0_i32_1 = arith.constant 0 : i32
    return %c0_i32, %c0_i32_0 : i32, i32
  }
  func.func @transform_4(%arg0: i32) -> (i32, i32) {
    %c0_i32 = arith.constant 0 : i32
    %c0_i32_0 = arith.constant 0 : i32
    %c0_i32_1 = arith.constant 0 : i32
    return %c0_i32, %c0_i32_0 : i32, i32
  }
  func.func @transform_5(%arg0: i32) -> (i32, i32) {
    %c0_i32 = arith.constant 0 : i32
    %c0_i32_0 = arith.constant 0 : i32
    %c0_i32_1 = arith.constant 0 : i32
    return %c0_i32, %c0_i32_0 : i32, i32
  }
  func.func @transform_6(%arg0: i32) -> (i32, i32) {
    %c0_i32 = arith.constant 0 : i32
    %c0_i32_0 = arith.constant 0 : i32
    %c0_i32_1 = arith.constant 0 : i32
    return %c0_i32, %c0_i32_0 : i32, i32
  }
  func.func @transform_7(%arg0: i32) -> (i32, i32) {
    %c0_i32 = arith.constant 0 : i32
    %c0_i32_0 = arith.constant 0 : i32
    %c0_i32_1 = arith.constant 0 : i32
    return %c0_i32, %c0_i32_0 : i32, i32
  }
  func.func @transform_8(%arg0: i32) -> (i32, i32) {
    %c0_i32 = arith.constant 0 : i32
    %c0_i32_0 = arith.constant 0 : i32
    %c0_i32_1 = arith.constant 0 : i32
    return %c0_i32, %c0_i32_0 : i32, i32
  }
  func.func @transform_9(%arg0: i32) -> (i32, i32) {
    %c0_i32 = arith.constant 0 : i32
    %c0_i32_0 = arith.constant 0 : i32
    return %c0_i32, %arg0 : i32, i32
  }
}

</mosaic_0001>

<bundles_post_ra>
// kernel: tpu_custom_call.1
= control target key start
LH: loop header
LB: loop body
LE: loop exit
PB: predicated region body
PF: predicated region fallthrough
CT: control target
= control target key end

     0   :  { %14 = vsyncpa [#allocation3], 0  ;;  %s2304_s0 = inlined_call_operand.vmem [shape: f32[512,12], index: 0, kind: input, shape index: {}]   ;;  %s2305_s1 = inlined_call_operand.vmem [shape: f32[512,4], index: 1, kind: input, shape index: {}]   ;;  %s2306_s2 = inlined_call_operand.vmem [shape: f32[12,64], index: 2, kind: input, shape index: {}]   ;;  %s2307_s3 = inlined_call_operand.vmem [shape: f32[4,64], index: 3, kind: input, shape index: {}]   ;;  %s2308_s4 = inlined_call_operand.vmem [shape: f32[1,64], index: 4, kind: input, shape index: {}]   ;;  %s2309_s5 = inlined_call_operand.vmem [shape: f32[64,64], index: 5, kind: input, shape index: {}]   ;;  %s2310_s6 = inlined_call_operand.vmem [shape: f32[1,64], index: 6, kind: input, shape index: {}]   ;;  %s2311_s7 = inlined_call_operand.vmem [shape: f32[64,128], index: 7, kind: input, shape index: {}]   ;;  %s2312_s8 = inlined_call_operand.vmem [shape: f32[1,128], index: 8, kind: input, shape index: {}]   ;;  %s2313_s9 = inlined_call_operand.hbm [shape: f32[2,512], index: 9, kind: output, shape index: {}]  }
   0x1   :  { %16 = vsyncpa [#allocation3 + $0x1], 0  ;;  %s1853_s30 = smov 0   ;;  %s1855_s10 = smov 0  }
   0x2   :  { %s1857_s11 = smov 0   ;;  %s1859_s12 = smov 0  }
   0x3 LB: > { %s1874_s13 = sadd.s32 4294967295, %s1801_s12   ;;  %s1552_s14 = sadd.s32 4294967294, %s1801_s12   ;;  %s1801_s12 = sphi %s1859_s12, %s2319_s12   ;;  %s1797_s11 = sphi %s1857_s11, %s2318_s11   ;;  %s1793_s10 = sphi %s1855_s10, %s2317_s10   ;;  %s1789_s30 = sphi %s1853_s30, %s2316_s30  }
   0x4   : > { %s1878_s15 = sadd.s32 1, %s1801_s12   ;;  %s228_s16 = sadd.s32 1, %s1797_s11 }
   0x5   : > { %s225_s17 = ssub.s32 %s1801_s12, %s1878_s15  ;;  %p238_p0 = scmp.ne.s32.totalorder %s1797_s11, %s1793_s10 }
   0x6   : > { %p226_p1 = scmp.eq.s32.totalorder %s225_s17, 0  ;;  %p239_p2 = scmp.eq.s32.totalorder %s1874_s13, 1 }
   0x7   : > { %p244_p3 = scmp.ne.s32.totalorder %s1793_s10, %s1789_s30  ;;  %p245_p4 = scmp.eq.s32.totalorder %s1552_s14, 1 }
   0x8   : > { %s1889_s18 = scalar_select %p226_p1, %s1797_s11, %s228_s16  }
   0x9   : > { %p1891_p5 = por %p239_p2, %p238_p0  ;;  %p1895_p6 = por %p245_p4, %p244_p3 }
   0xa   : > { %p1555_p7 = scmp.ge.s32.totalorder %s1801_s12, 1  ;;  %p302_p8 = scmp.lt.s32.totalorder %s1801_s12, 3 }
   0xc   : > { %p303_p9 = pnand %p1555_p7, %p302_p8 }
   0xd   : > { %s1557_s27 = sshll.u32 (!%p303_p9), %s1874_s13, 5  ;;  %s340_s29 = sand.u32 (!%p303_p9), 1, %s1793_s10  }
   0xe   : > { %306 = sbr.rel (%p303_p9) target bundleno = 725 (0x2d5), region = 56  ;;  %p344_p10 = scmp.lt.s32.totalorder (!%p303_p9), %s1557_s27, 63 }
   0xf   : > { %s1556_s14 = sshll.u32 (!%p303_p9), %s340_s29, 2  ;;  %s1696_s17 = sshll.u32 (!%p303_p9), %s1874_s13, 2 }
  0x10   : > { %s1476_s24 = scalar_lea.hbm (!%p303_p9), %s2313_s9, %s1696_s17  ;;  %s342_s25 = scalar_lea.vmem (!%p303_p9), [#allocation2], %s1556_s14 }
  0x11   : > { %s1478_s26 = sshll.u32 (!%p303_p9), %s342_s25, 4  ;;  %s1759_s17 = scalar_lea.hbm (!%p303_p9), %s2313_s9, 8  ;;  %s1479_s26 = int_to_ptr.vmem [resolvable:$true] %s1478_s26 }
  0x13   : > { %v389_v0 = vld [vmem:[%s2306_s2 + $0x8] sm:$0xf]  ;;  %vm520_vm0 = vcmask 1043456   ;;  %v422_v1 = vld [vmem:[%s2307_s3] sm:$0xf]  ;;  %s2321_s27 = smov (!%p344_p10, %s1557_s27), 63 }
  0x14   : > { %v388_v2 = vld [vmem:[%s2306_s2] sm:$0xff]  ;;  %1594 = vmatpush.msk.msra.mxu1 %vm520_vm0, %v389_v0  ;;  %1561 = vmatpush.msk.msra.mxu0 %vm520_vm0, %v422_v1  ;;  %s1558_s28 = sshll.u32 %s2321_s27, 3  ;;  %vm423_vm1 = vcmask 31744   ;;  %vm637_vm2 = vcmask 97280   ;;  %v925_v25 = vld [vmem:[%s2309_s5 + $0x38] sm:$0xff]  ;;  %v924_v26 = vld [vmem:[%s2309_s5 + $0x30] sm:$0xff] }
  0x15   : > { %s1914_s16 = scalar_lea.vmem %s2305_s1, %s1558_s28  ;;  %s1919_s22 = scalar_lea.vmem %s2304_s0, %s1558_s28  ;;  %1035 = vmatpush.msra.mxu2 %v925_v25  ;;  %v923_v29 = vld [vmem:[%s2309_s5 + $0x28] sm:$0xff]  ;;  %v922_v30 = vld [vmem:[%s2309_s5 + $0x20] sm:$0xff]  ;;  %v921_v31 = vld [vmem:[%s2309_s5 + $0x18] sm:$0xff]  ;;  %vm930_vm3 = vcmask 523264   ;;  %vm1460_vm4 = vcmask 1041408  }
  0x16   : > { %752 = vmatpush.msra.mxu1 %v388_v2  ;;  %v390_v3 = vld [vmem:[%s1914_s16] sm:$0xff]  ;;  %v391_v5 = vld [vmem:[%s1914_s16 + $0x8] sm:$0xff]  ;;  %v392_v7 = vld [vmem:[%s1914_s16 + $0x10] sm:$0xff] }
  0x17   : > { %v356_v4 = vld [vmem:[%s1919_s22] sm:$0xff]  ;;  %1562 = vmatmul.msk.f32.vlgmr.msra.gmra.mxu0 %vm423_vm1, %v390_v3  ;;  %v357_v6 = vld [vmem:[%s1919_s22 + $0x8] sm:$0xff]  ;;  %v358_v8 = vld [vmem:[%s1919_s22 + $0x10] sm:$0xff]  ;;  %1036 = vmatpush.msra.mxu2 %v924_v26 }
  0x18   : > { %1595 = vmatmul.msk.f32.vlgmr.msra.gmra.mxu1 %vm637_vm2, %v356_v4  ;;  %v393_v9 = vld [vmem:[%s1914_s16 + $0x18] sm:$0xff]  ;;  %v394_v11 = vld [vmem:[%s1914_s16 + $0x20] sm:$0xff]  ;;  %v395_v13 = vld [vmem:[%s1914_s16 + $0x28] sm:$0xff] }
  0x19   : > { %v359_v10 = vld [vmem:[%s1919_s22 + $0x18] sm:$0xff]  ;;  %v360_v12 = vld [vmem:[%s1919_s22 + $0x20] sm:$0xff]  ;;  %v361_v14 = vld [vmem:[%s1919_s22 + $0x28] sm:$0xff]  ;;  %1037 = vmatpush.msra.mxu2 %v923_v29 }
  0x1a   : > { %v396_v15 = vld [vmem:[%s1914_s16 + $0x30] sm:$0xff]  ;;  %v397_v17 = vld [vmem:[%s1914_s16 + $0x38] sm:$0xff]  ;;  %v398_v19 = vld [vmem:[%s1914_s16 + $0x40] sm:$0xff] }
  0x1b   : > { %v362_v16 = vld [vmem:[%s1919_s22 + $0x30] sm:$0xff]  ;;  %v363_v18 = vld [vmem:[%s1919_s22 + $0x38] sm:$0xff]  ;;  %v364_v20 = vld [vmem:[%s1919_s22 + $0x40] sm:$0xff]  ;;  %1038 = vmatpush.msra.mxu2 %v922_v30 }
  0x1c   : > { %v399_v21 = vld [vmem:[%s1914_s16 + $0x48] sm:$0xff]  ;;  %v400_v23 = vld [vmem:[%s1914_s16 + $0x50] sm:$0xff]  ;;  %v401_v27 = vld [vmem:[%s1914_s16 + $0x58] sm:$0xff] }
  0x1d   : > { %v365_v22 = vld [vmem:[%s1919_s22 + $0x48] sm:$0xff]  ;;  %v366_v24 = vld [vmem:[%s1919_s22 + $0x50] sm:$0xff]  ;;  %v367_v28 = vld [vmem:[%s1919_s22 + $0x58] sm:$0xff]  ;;  %1039 = vmatpush.msra.mxu2 %v921_v31 }
  0x1e   : > { %v402_v32 = vld [vmem:[%s1914_s16 + $0x60] sm:$0xff]  ;;  %v920_v34 = vld [vmem:[%s2309_s5 + $0x10] sm:$0xff]  ;;  %v919_v35 = vld [vmem:[%s2309_s5 + $0x8] sm:$0xff] }
  0x1f   : > { %1563 = vmatmul.msk.f32.gmra.mxu0 %vm423_vm1, %v391_v5  ;;  %v368_v33 = vld [vmem:[%s1919_s22 + $0x60] sm:$0xff]  ;;  %1040 = vmatpush.msra.mxu2 %v920_v34  ;;  %v403_v37 = vld [vmem:[%s1914_s16 + $0x68] sm:$0xff]  ;;  %v404_v39 = vld [vmem:[%s1914_s16 + $0x70] sm:$0xff] }
  0x20   : > { %1596 = vmatmul.msk.f32.gmra.mxu1 %vm637_vm2, %v357_v6  ;;  %v918_v36 = vld [vmem:[%s2309_s5] sm:$0xff]  ;;  %v369_v38 = vld [vmem:[%s1919_s22 + $0x68] sm:$0xff]  ;;  %v370_v40 = vld [vmem:[%s1919_s22 + $0x70] sm:$0xff] }
  0x21   : > { %1041 = vmatpush.msra.mxu2 %v919_v35  ;;  %v405_v41 = vld [vmem:[%s1914_s16 + $0x78] sm:$0xff]  ;;  %v2012_v43 = vld [vmem:[%s2308_s4] ss:$0 sm:$0xff]  ;;  %v407_v53 = vld [vmem:[%s1914_s16 + $0x88] sm:$0xff] }
  0x22   : > { %v371_v42 = vld [vmem:[%s1919_s22 + $0x78] sm:$0xff]  ;;  %v406_v46 = vld [vmem:[%s1914_s16 + $0x80] sm:$0xff]  ;;  %v373_v54 = vld [vmem:[%s1919_s22 + $0x88] sm:$0xff] }
  0x23   : > { %1042 = vmatpush.msra.mxu2 %v918_v36  ;;  %v372_v47 = vld [vmem:[%s1919_s22 + $0x80] sm:$0xff]  ;;  %v408_v60 = vld [vmem:[%s1914_s16 + $0x90] sm:$0xff]  ;;  %v409_v3 = vld [vmem:[%s1914_s16 + $0x98] sm:$0xff] }
  0x24   : > { %v374_v61 = vld [vmem:[%s1919_s22 + $0x90] sm:$0xff]  ;;  %v375_v4 = vld [vmem:[%s1919_s22 + $0x98] sm:$0xff] }
  0x25   : > { %v378_v25 = vld [vmem:[%s1919_s22 + $0xb0] sm:$0xff]  ;;  %v413_v31 = vld [vmem:[%s1914_s16 + $0xb8] sm:$0xff] }
  0x27   : > { %1564 = vmatmul.msk.f32.gmra.mxu0 %vm423_vm1, %v392_v7 }
  0x28   : > { %1597 = vmatmul.msk.f32.gmra.mxu1 %vm637_vm2, %v358_v8 }
  0x2f   : > { %1565 = vmatmul.msk.f32.gmra.mxu0 %vm423_vm1, %v393_v9 }
  0x30   : > { %1598 = vmatmul.msk.f32.gmra.mxu1 %vm637_vm2, %v359_v10  ;;  %v410_v10 = vld [vmem:[%s1914_s16 + $0xa0] sm:$0xff] }
  0x37   : > { %1566 = vmatmul.msk.f32.gmra.mxu0 %vm423_vm1, %v394_v11  ;;  %v376_v11 = vld [vmem:[%s1919_s22 + $0xa0] sm:$0xff] }
  0x38   : > { %1599 = vmatmul.msk.f32.gmra.mxu1 %vm637_vm2, %v360_v12 }
  0x3f   : > { %1567 = vmatmul.msk.f32.gmra.mxu0 %vm423_vm1, %v395_v13 }
  0x40   : > { %1600 = vmatmul.msk.f32.gmra.mxu1 %vm637_vm2, %v361_v14 }
  0x47   : > { %1568 = vmatmul.msk.f32.gmra.mxu0 %vm423_vm1, %v396_v15 }
  0x48   : > { %1601 = vmatmul.msk.f32.gmra.mxu1 %vm637_vm2, %v362_v16 }
  0x4f   : > { %1569 = vmatmul.msk.f32.gmra.mxu0 %vm423_vm1, %v397_v17  ;;  %v411_v17 = vld [vmem:[%s1914_s16 + $0xa8] sm:$0xff] }
  0x50   : > { %1602 = vmatmul.msk.f32.gmra.mxu1 %vm637_vm2, %v363_v18  ;;  %v377_v18 = vld [vmem:[%s1919_s22 + $0xa8] sm:$0xff] }
  0x57   : > { %1570 = vmatmul.msk.f32.gmra.mxu0 %vm423_vm1, %v398_v19 }
  0x58   : > { %1603 = vmatmul.msk.f32.gmra.mxu1 %vm637_vm2, %v364_v20 }
  0x5f   : > { %1571 = vmatmul.msk.f32.gmra.mxu0 %vm423_vm1, %v399_v21 }
  0x60   : > { %1604 = vmatmul.msk.f32.gmra.mxu1 %vm637_vm2, %v365_v22 }
  0x67   : > { %1572 = vmatmul.msk.f32.gmra.mxu0 %vm423_vm1, %v400_v23 }
  0x68   : > { %1605 = vmatmul.msk.f32.gmra.mxu1 %vm637_vm2, %v366_v24  ;;  %v412_v24 = vld [vmem:[%s1914_s16 + $0xb0] sm:$0xff] }
  0x6f   : > { %1573 = vmatmul.msk.f32.gmra.mxu0 %vm423_vm1, %v401_v27 }
  0x70   : > { %1606 = vmatmul.msk.f32.gmra.mxu1 %vm637_vm2, %v367_v28 }
  0x77   : > { %1574 = vmatmul.msk.f32.gmra.mxu0 %vm423_vm1, %v402_v32  ;;  %v379_v32 = vld [vmem:[%s1919_s22 + $0xb8] sm:$0xff] }
  0x78   : > { %1607 = vmatmul.msk.f32.gmra.mxu1 %vm637_vm2, %v368_v33 }
  0x7f   : > { %1575 = vmatmul.msk.f32.gmra.mxu0 %vm423_vm1, %v403_v37 }
  0x80   : > { %1608 = vmatmul.msk.f32.gmra.mxu1 %vm637_vm2, %v369_v38  ;;  %v414_v38 = vld [vmem:[%s1914_s16 + $0xc0] sm:$0xff] }
  0x87   : > { %1576 = vmatmul.msk.f32.gmra.mxu0 %vm423_vm1, %v404_v39  ;;  %v380_v39 = vld [vmem:[%s1919_s22 + $0xc0] sm:$0xff] }
  0x88   : > { %1609 = vmatmul.msk.f32.gmra.mxu1 %vm637_vm2, %v370_v40 }
  0x8f   : > { %1577 = vmatmul.msk.f32.gmra.mxu0 %vm423_vm1, %v405_v41 }
  0x90   : > { %1610 = vmatmul.msk.f32.gmra.mxu1 %vm637_vm2, %v371_v42 }
  0x94   : > { %v541_v44 = vpop.f32.mrf.mxu0 }
  0x95   : > { %v754_v45 = vpop.f32.mrf.mxu1 }
  0x96   : > { %v755_v48 = vadd.f32 %v754_v45, %v541_v44 }
  0x97   : > { %1578 = vmatmul.msk.f32.gmra.mxu0 %vm423_vm1, %v406_v46  ;;  %v415_v46 = vld [vmem:[%s1914_s16 + $0xc8] sm:$0xff] }
  0x98   : > { %v854_v49 = vadd.f32 %v2012_v43, %v755_v48  ;;  %1611 = vmatmul.msk.f32.gmra.mxu1 %vm637_vm2, %v372_v47  ;;  %v381_v47 = vld [vmem:[%s1919_s22 + $0xc8] sm:$0xff] }
  0x9a   : > { %v886_v50 = vmax.f32 %v854_v49, 0.0 }
  0x9c   : > { %1627 = vmatmul.msk.f32.vlgmr.msra.gmra.mxu2 %vm930_vm3, %v886_v50  ;;  %v544_v51 = vpop.f32.mrf.mxu0 }
  0x9d   : > { %v757_v52 = vpop.f32.mrf.mxu1 }
  0x9e   : > { %v758_v55 = vadd.f32 %v757_v52, %v544_v51 }
  0x9f   : > { %1579 = vmatmul.msk.f32.gmra.mxu0 %vm423_vm1, %v407_v53  ;;  %v416_v53 = vld [vmem:[%s1914_s16 + $0xd0] sm:$0xff] }
  0xa0   : > { %v855_v56 = vadd.f32 %v2012_v43, %v758_v55  ;;  %1612 = vmatmul.msk.f32.gmra.mxu1 %vm637_vm2, %v373_v54  ;;  %v382_v54 = vld [vmem:[%s1919_s22 + $0xd0] sm:$0xff] }
  0xa2   : > { %v887_v57 = vmax.f32 %v855_v56, 0.0 }
  0xa4   : > { %1628 = vmatmul.msk.f32.gmra.mxu2 %vm930_vm3, %v887_v57  ;;  %v547_v58 = vpop.f32.mrf.mxu0 }
  0xa5   : > { %v760_v59 = vpop.f32.mrf.mxu1 }
  0xa6   : > { %v761_v62 = vadd.f32 %v760_v59, %v547_v58 }
  0xa7   : > { %1580 = vmatmul.msk.f32.gmra.mxu0 %vm423_vm1, %v408_v60  ;;  %v417_v60 = vld [vmem:[%s1914_s16 + $0xd8] sm:$0xff] }
  0xa8   : > { %v856_v63 = vadd.f32 %v2012_v43, %v761_v62  ;;  %1613 = vmatmul.msk.f32.gmra.mxu1 %vm637_vm2, %v374_v61  ;;  %v383_v61 = vld [vmem:[%s1919_s22 + $0xd8] sm:$0xff] }
  0xaa   : > { %v888_v0 = vmax.f32 %v856_v63, 0.0 }
  0xac   : > { %1629 = vmatmul.msk.f32.gmra.mxu2 %vm930_vm3, %v888_v0  ;;  %v550_v1 = vpop.f32.mrf.mxu0 }
  0xad   : > { %v763_v2 = vpop.f32.mrf.mxu1 }
  0xae   : > { %v764_v5 = vadd.f32 %v763_v2, %v550_v1  ;;  %v1179_v1 = vld [vmem:[%s2311_s7 + $0x38] sm:$0xff] }
  0xaf   : > { %1581 = vmatmul.msk.f32.gmra.mxu0 %vm423_vm1, %v409_v3  ;;  %1288 = vmatpush.msra.mxu3 %v1179_v1 }
  0xb0   : > { %v857_v6 = vadd.f32 %v2012_v43, %v764_v5  ;;  %1614 = vmatmul.msk.f32.gmra.mxu1 %vm637_vm2, %v375_v4  ;;  %v418_v4 = vld [vmem:[%s1914_s16 + $0xe0] sm:$0xff] }
  0xb1   : > { %v384_v5 = vld [vmem:[%s1919_s22 + $0xe0] sm:$0xff] }
  0xb2   : > { %v889_v7 = vmax.f32 %v857_v6, 0.0 }
  0xb4   : > { %1630 = vmatmul.msk.f32.gmra.mxu2 %vm930_vm3, %v889_v7  ;;  %v553_v8 = vpop.f32.mrf.mxu0  ;;  %v1178_v7 = vld [vmem:[%s2311_s7 + $0x30] sm:$0xff] }
  0xb5   : > { %v766_v9 = vpop.f32.mrf.mxu1  ;;  %1289 = vmatpush.msra.mxu3 %v1178_v7 }
  0xb6   : > { %v767_v12 = vadd.f32 %v766_v9, %v553_v8  ;;  %v1177_v9 = vld [vmem:[%s2311_s7 + $0x28] sm:$0xff] }
  0xb7   : > { %1582 = vmatmul.msk.f32.gmra.mxu0 %vm423_vm1, %v410_v10  ;;  %1290 = vmatpush.msra.mxu3 %v1177_v9 }
  0xb8   : > { %v858_v13 = vadd.f32 %v2012_v43, %v767_v12  ;;  %1615 = vmatmul.msk.f32.gmra.mxu1 %vm637_vm2, %v376_v11  ;;  %v1176_v11 = vld [vmem:[%s2311_s7 + $0x20] sm:$0xff]  ;;  %v1175_v12 = vld [vmem:[%s2311_s7 + $0x18] sm:$0xff] }
  0xb9   : > { %1291 = vmatpush.msra.mxu3 %v1176_v11 }
  0xba   : > { %v890_v14 = vmax.f32 %v858_v13, 0.0 }
  0xbb   : > { %1292 = vmatpush.msra.mxu3 %v1175_v12 }
  0xbc   : > { %1631 = vmatmul.msk.f32.gmra.mxu2 %vm930_vm3, %v890_v14  ;;  %v556_v15 = vpop.f32.mrf.mxu0 }
  0xbd   : > { %v769_v16 = vpop.f32.mrf.mxu1 }
  0xbe   : > { %v770_v19 = vadd.f32 %v769_v16, %v556_v15  ;;  %v419_v15 = vld [vmem:[%s1914_s16 + $0xe8] sm:$0xff] }
  0xbf   : > { %1583 = vmatmul.msk.f32.gmra.mxu0 %vm423_vm1, %v411_v17  ;;  %v385_v16 = vld [vmem:[%s1919_s22 + $0xe8] sm:$0xff] }
  0xc0   : > { %v859_v20 = vadd.f32 %v2012_v43, %v770_v19  ;;  %1616 = vmatmul.msk.f32.gmra.mxu1 %vm637_vm2, %v377_v18  ;;  %v1174_v18 = vld [vmem:[%s2311_s7 + $0x10] sm:$0xff] }
  0xc1   : > { %1293 = vmatpush.msra.mxu3 %v1174_v18 }
  0xc2   : > { %v891_v21 = vmax.f32 %v859_v20, 0.0  ;;  %v1173_v20 = vld [vmem:[%s2311_s7 + $0x8] sm:$0xff] }
  0xc3   : > { %1294 = vmatpush.msra.mxu3 %v1173_v20 }
  0xc4   : > { %1632 = vmatmul.msk.f32.gmra.mxu2 %vm930_vm3, %v891_v21  ;;  %v559_v22 = vpop.f32.mrf.mxu0 }
  0xc5   : > { %v772_v23 = vpop.f32.mrf.mxu1 }
  0xc6   : > { %v773_v26 = vadd.f32 %v772_v23, %v559_v22  ;;  %v1172_v22 = vld [vmem:[%s2311_s7] sm:$0xff] }
  0xc7   : > { %1584 = vmatmul.msk.f32.gmra.mxu0 %vm423_vm1, %v412_v24  ;;  %1295 = vmatpush.msra.mxu3 %v1172_v22 }
  0xc8   : > { %v860_v27 = vadd.f32 %v2012_v43, %v773_v26  ;;  %1617 = vmatmul.msk.f32.gmra.mxu1 %vm637_vm2, %v378_v25  ;;  %v420_v25 = vld [vmem:[%s1914_s16 + $0xf0] sm:$0xff] }
  0xc9   : > { %v386_v26 = vld [vmem:[%s1919_s22 + $0xf0] sm:$0xff] }
  0xca   : > { %v892_v28 = vmax.f32 %v860_v27, 0.0 }
  0xcc   : > { %1633 = vmatmul.msk.f32.gmra.mxu2 %vm930_vm3, %v892_v28  ;;  %v562_v29 = vpop.f32.mrf.mxu0 }
  0xcd   : > { %v775_v30 = vpop.f32.mrf.mxu1 }
  0xce   : > { %v776_v33 = vadd.f32 %v775_v30, %v562_v29 }
  0xcf   : > { %1585 = vmatmul.msk.f32.gmra.mxu0 %vm423_vm1, %v413_v31 }
  0xd0   : > { %v861_v34 = vadd.f32 %v2012_v43, %v776_v33  ;;  %1618 = vmatmul.msk.f32.gmra.mxu1 %vm637_vm2, %v379_v32  ;;  %v421_v32 = vld [vmem:[%s1914_s16 + $0xf8] sm:$0xff]  ;;  %s1480_s16 = sshll.u32 %s1476_s24, 4  ;;  %s1481_s16 = int_to_ptr.hbm [resolvable:$true] %s1480_s16 }
  0xd1   : > { %v387_v33 = vld [vmem:[%s1919_s22 + $0xf8] sm:$0xff]  ;;  %s1465_s22 = scalar_lea.sflag [#allocation3], %s340_s29  ;;  %s1753_s27 = sshra.s32 %s1481_s16, 4  ;;  %s1754_s27 = int_to_ptr.hbm [resolvable:$true] %s1753_s27 }
  0xd2   : > { %v893_v35 = vmax.f32 %v861_v34, 0.0  ;;  %s1755_s13 = scalar_lea.hbm %s1754_s27, 4  ;;  %p1760_p0 = scmp.lt.s32.totalorder %s1754_s27, %s2313_s9 }
  0xd3   : > { %p1756_p11 = scmp.ne.s32.totalorder %s1754_s27, %s1755_s13  ;;  %p1761_p1 = scmp.lt.s32.totalorder %s1759_s17, %s1755_s13 }
  0xd4   : > { %1634 = vmatmul.msk.f32.gmra.mxu2 %vm930_vm3, %v893_v35  ;;  %v565_v36 = vpop.f32.mrf.mxu0 }
  0xd5   : > { %v778_v37 = vpop.f32.mrf.mxu1  ;;  %p1757_p12 = pnand %p1756_p11, %p1891_p5  ;;  %p1762_p2 = por %p1761_p1, %p1760_p0 }
  0xd6   : > { %v779_v40 = vadd.f32 %v778_v37, %v565_v36 }
  0xd7   : > { %1586 = vmatmul.msk.f32.gmra.mxu0 %vm423_vm1, %v414_v38  ;;  %p1758_p13 = pneg %p1757_p12 }
  0xd8   : > { %v862_v41 = vadd.f32 %v2012_v43, %v779_v40  ;;  %1619 = vmatmul.msk.f32.gmra.mxu1 %vm637_vm2, %v380_v39 }
  0xd9   : > { %p1763_p3 = pnand %p1762_p2, %p1758_p13 }
  0xda   : > { %v894_v42 = vmax.f32 %v862_v41, 0.0 }
  0xdc   : > { %1635 = vmatmul.msk.f32.gmra.mxu2 %vm930_vm3, %v894_v42  ;;  %v568_v44 = vpop.f32.mrf.mxu0  ;;  %v2139_v42 = vld [vmem:[%s2310_s6] ss:$0 sm:$0xff] }
  0xdd   : > { %v781_v45 = vpop.f32.mrf.mxu1 }
  0xde   : > { %v782_v48 = vadd.f32 %v781_v45, %v568_v44 }
  0xdf   : > { %1587 = vmatmul.msk.f32.gmra.mxu0 %vm423_vm1, %v415_v46 }
  0xe0   : > { %v863_v49 = vadd.f32 %v2012_v43, %v782_v48  ;;  %1620 = vmatmul.msk.f32.gmra.mxu1 %vm637_vm2, %v381_v47 }
  0xe2   : > { %v895_v50 = vmax.f32 %v863_v49, 0.0 }
  0xe4   : > { %1636 = vmatmul.msk.f32.gmra.mxu2 %vm930_vm3, %v895_v50  ;;  %v571_v51 = vpop.f32.mrf.mxu0 }
  0xe5   : > { %v784_v52 = vpop.f32.mrf.mxu1 }
  0xe6   : > { %v785_v55 = vadd.f32 %v784_v52, %v571_v51 }
  0xe7   : > { %1588 = vmatmul.msk.f32.gmra.mxu0 %vm423_vm1, %v416_v53 }
  0xe8   : > { %v864_v56 = vadd.f32 %v2012_v43, %v785_v55  ;;  %1621 = vmatmul.msk.f32.gmra.mxu1 %vm637_vm2, %v382_v54 }
  0xea   : > { %v896_v57 = vmax.f32 %v864_v56, 0.0 }
  0xec   : > { %1637 = vmatmul.msk.f32.gmra.mxu2 %vm930_vm3, %v896_v57  ;;  %v574_v58 = vpop.f32.mrf.mxu0 }
  0xed   : > { %v787_v59 = vpop.f32.mrf.mxu1 }
  0xee   : > { %v788_v62 = vadd.f32 %v787_v59, %v574_v58 }
  0xef   : > { %1589 = vmatmul.msk.f32.gmra.mxu0 %vm423_vm1, %v417_v60 }
  0xf0   : > { %v865_v63 = vadd.f32 %v2012_v43, %v788_v62  ;;  %1622 = vmatmul.msk.f32.gmra.mxu1 %vm637_vm2, %v383_v61 }
  0xf2   : > { %v897_v0 = vmax.f32 %v865_v63, 0.0 }
  0xf4   : > { %1638 = vmatmul.msk.f32.gmra.mxu2 %vm930_vm3, %v897_v0  ;;  %v577_v2 = vpop.f32.mrf.mxu0 }
  0xf5   : > { %v790_v3 = vpop.f32.mrf.mxu1 }
  0xf6   : > { %v791_v6 = vadd.f32 %v790_v3, %v577_v2 }
  0xf7   : > { %1590 = vmatmul.msk.f32.gmra.mxu0 %vm423_vm1, %v418_v4 }
  0xf8   : > { %v866_v8 = vadd.f32 %v2012_v43, %v791_v6  ;;  %1623 = vmatmul.msk.f32.gmra.mxu1 %vm637_vm2, %v384_v5 }
  0xfa   : > { %v898_v10 = vmax.f32 %v866_v8, 0.0 }
  0xfc   : > { %1639 = vmatmul.msk.f32.gmra.mxu2 %vm930_vm3, %v898_v10  ;;  %v580_v13 = vpop.f32.mrf.mxu0 }
  0xfd   : > { %v793_v14 = vpop.f32.mrf.mxu1 }
  0xfe   : > { %v794_v17 = vadd.f32 %v793_v14, %v580_v13 }
  0xff   : > { %1591 = vmatmul.msk.f32.gmra.mxu0 %vm423_vm1, %v419_v15 }
 0x100   : > { %v867_v19 = vadd.f32 %v2012_v43, %v794_v17  ;;  %1624 = vmatmul.msk.f32.gmra.mxu1 %vm637_vm2, %v385_v16 }
 0x102   : > { %v899_v21 = vmax.f32 %v867_v19, 0.0 }
 0x104   : > { %1640 = vmatmul.msk.f32.gmra.mxu2 %vm930_vm3, %v899_v21  ;;  %v583_v23 = vpop.f32.mrf.mxu0 }
 0x105   : > { %v796_v24 = vpop.f32.mrf.mxu1 }
 0x106   : > { %v797_v27 = vadd.f32 %v796_v24, %v583_v23 }
 0x107   : > { %1592 = vmatmul.msk.f32.gmra.mxu0 %vm423_vm1, %v420_v25 }
 0x108   : > { %v868_v28 = vadd.f32 %v2012_v43, %v797_v27  ;;  %1625 = vmatmul.msk.f32.gmra.mxu1 %vm637_vm2, %v386_v26 }
 0x10a   : > { %v900_v29 = vmax.f32 %v868_v28, 0.0 }
 0x10c   : > { %1641 = vmatmul.msk.f32.gmra.mxu2 %vm930_vm3, %v900_v29  ;;  %v586_v30 = vpop.f32.mrf.mxu0 }
 0x10d   : > { %v799_v31 = vpop.f32.mrf.mxu1 }
 0x10e   : > { %v800_v34 = vadd.f32 %v799_v31, %v586_v30 }
 0x10f   : > { %1593 = vmatmul.msk.f32.gmra.mxu0 %vm423_vm1, %v421_v32 }
 0x110   : > { %v869_v35 = vadd.f32 %v2012_v43, %v800_v34  ;;  %1626 = vmatmul.msk.f32.gmra.mxu1 %vm637_vm2, %v387_v33 }
 0x112   : > { %v901_v36 = vmax.f32 %v869_v35, 0.0 }
 0x114   : > { %1642 = vmatmul.msk.f32.gmra.mxu2 %vm930_vm3, %v901_v36  ;;  %v589_v37 = vpop.f32.mrf.mxu0 }
 0x115   : > { %v802_v38 = vpop.f32.mrf.mxu1 }
 0x116   : > { %v803_v39 = vadd.f32 %v802_v38, %v589_v37 }
 0x118   : > { %v870_v40 = vadd.f32 %v2012_v43, %v803_v39 }
 0x11a   : > { %v902_v41 = vmax.f32 %v870_v40, 0.0 }
 0x11c   : > { %1643 = vmatmul.msk.f32.gmra.mxu2 %vm930_vm3, %v902_v41  ;;  %v592_v44 = vpop.f32.mrf.mxu0 }
 0x11d   : > { %v805_v45 = vpop.f32.mrf.mxu1 }
 0x11e   : > { %v806_v46 = vadd.f32 %v805_v45, %v592_v44 }
 0x11f   : > { %v1044_v47 = vpop.f32.mrf.mxu2 }
 0x120   : > { %v871_v48 = vadd.f32 %v2012_v43, %v806_v46  ;;  %v1045_v49 = vadd.f32 %v2139_v42, %v1044_v47 }
 0x122   : > { %v903_v50 = vmax.f32 %v871_v48, 0.0  ;;  %v1140_v51 = vmax.f32 %v1045_v49, 0.0 }
 0x124   : > { %1644 = vmatmul.msk.f32.gmra.mxu2 %vm930_vm3, %v903_v50  ;;  %1659 = vmatmul.msk.f32.vlgmr.msra.gmra.mxu3 %vm930_vm3, %v1140_v51  ;;  %v595_v52 = vpop.f32.mrf.mxu0 }
 0x125   : > { %v808_v53 = vpop.f32.mrf.mxu1 }
 0x126   : > { %v809_v54 = vadd.f32 %v808_v53, %v595_v52 }
 0x127   : > { %v1047_v55 = vpop.f32.mrf.mxu2 }
 0x128   : > { %v872_v56 = vadd.f32 %v2012_v43, %v809_v54  ;;  %v1048_v57 = vadd.f32 %v2139_v42, %v1047_v55 }
 0x12a   : > { %v904_v58 = vmax.f32 %v872_v56, 0.0  ;;  %v1141_v59 = vmax.f32 %v1048_v57, 0.0 }
 0x12c   : > { %1645 = vmatmul.msk.f32.gmra.mxu2 %vm930_vm3, %v904_v58  ;;  %1660 = vmatmul.msk.f32.gmra.mxu3 %vm930_vm3, %v1141_v59  ;;  %v598_v60 = vpop.f32.mrf.mxu0 }
 0x12d   : > { %v811_v61 = vpop.f32.mrf.mxu1 }
 0x12e   : > { %v812_v62 = vadd.f32 %v811_v61, %v598_v60 }
 0x12f   : > { %v1050_v63 = vpop.f32.mrf.mxu2 }
 0x130   : > { %v873_v0 = vadd.f32 %v2012_v43, %v812_v62  ;;  %v1051_v1 = vadd.f32 %v2139_v42, %v1050_v63 }
 0x132   : > { %v905_v2 = vmax.f32 %v873_v0, 0.0  ;;  %v1142_v3 = vmax.f32 %v1051_v1, 0.0 }
 0x134   : > { %1646 = vmatmul.msk.f32.gmra.mxu2 %vm930_vm3, %v905_v2  ;;  %1661 = vmatmul.msk.f32.gmra.mxu3 %vm930_vm3, %v1142_v3  ;;  %v601_v4 = vpop.f32.mrf.mxu0 }
 0x135   : > { %v814_v5 = vpop.f32.mrf.mxu1 }
 0x136   : > { %v815_v6 = vadd.f32 %v814_v5, %v601_v4 }
 0x137   : > { %v1053_v7 = vpop.f32.mrf.mxu2 }
 0x138   : > { %v874_v8 = vadd.f32 %v2012_v43, %v815_v6  ;;  %v1054_v9 = vadd.f32 %v2139_v42, %v1053_v7 }
 0x13a   : > { %v906_v10 = vmax.f32 %v874_v8, 0.0  ;;  %v1143_v11 = vmax.f32 %v1054_v9, 0.0 }
 0x13c   : > { %1647 = vmatmul.msk.f32.gmra.mxu2 %vm930_vm3, %v906_v10  ;;  %1662 = vmatmul.msk.f32.gmra.mxu3 %vm930_vm3, %v1143_v11  ;;  %v604_v12 = vpop.f32.mrf.mxu0 }
 0x13d   : > { %v817_v13 = vpop.f32.mrf.mxu1 }
 0x13e   : > { %v818_v14 = vadd.f32 %v817_v13, %v604_v12 }
 0x13f   : > { %v1056_v15 = vpop.f32.mrf.mxu2 }
 0x140   : > { %v875_v16 = vadd.f32 %v2012_v43, %v818_v14  ;;  %v1057_v17 = vadd.f32 %v2139_v42, %v1056_v15 }
 0x142   : > { %v907_v18 = vmax.f32 %v875_v16, 0.0  ;;  %v1144_v19 = vmax.f32 %v1057_v17, 0.0 }
 0x144   : > { %1648 = vmatmul.msk.f32.gmra.mxu2 %vm930_vm3, %v907_v18  ;;  %1663 = vmatmul.msk.f32.gmra.mxu3 %vm930_vm3, %v1144_v19  ;;  %v607_v20 = vpop.f32.mrf.mxu0 }
 0x145   : > { %v820_v21 = vpop.f32.mrf.mxu1 }
 0x146   : > { %v821_v22 = vadd.f32 %v820_v21, %v607_v20 }
 0x147   : > { %v1059_v23 = vpop.f32.mrf.mxu2 }
 0x148   : > { %v876_v24 = vadd.f32 %v2012_v43, %v821_v22  ;;  %v1060_v25 = vadd.f32 %v2139_v42, %v1059_v23 }
 0x14a   : > { %v908_v26 = vmax.f32 %v876_v24, 0.0  ;;  %v1145_v27 = vmax.f32 %v1060_v25, 0.0 }
 0x14c   : > { %1649 = vmatmul.msk.f32.gmra.mxu2 %vm930_vm3, %v908_v26  ;;  %1664 = vmatmul.msk.f32.gmra.mxu3 %vm930_vm3, %v1145_v27  ;;  %v610_v28 = vpop.f32.mrf.mxu0 }
 0x14d   : > { %v823_v29 = vpop.f32.mrf.mxu1 }
 0x14e   : > { %v824_v30 = vadd.f32 %v823_v29, %v610_v28 }
 0x14f   : > { %v1062_v31 = vpop.f32.mrf.mxu2 }
 0x150   : > { %v877_v32 = vadd.f32 %v2012_v43, %v824_v30  ;;  %v1063_v33 = vadd.f32 %v2139_v42, %v1062_v31 }
 0x152   : > { %v909_v34 = vmax.f32 %v877_v32, 0.0  ;;  %v1146_v35 = vmax.f32 %v1063_v33, 0.0 }
 0x154   : > { %1650 = vmatmul.msk.f32.gmra.mxu2 %vm930_vm3, %v909_v34  ;;  %1665 = vmatmul.msk.f32.gmra.mxu3 %vm930_vm3, %v1146_v35  ;;  %v613_v36 = vpop.f32.mrf.mxu0 }
 0x155   : > { %v826_v37 = vpop.f32.mrf.mxu1 }
 0x156   : > { %v827_v38 = vadd.f32 %v826_v37, %v613_v36 }
 0x157   : > { %v1065_v39 = vpop.f32.mrf.mxu2 }
 0x158   : > { %v878_v40 = vadd.f32 %v2012_v43, %v827_v38  ;;  %v1066_v41 = vadd.f32 %v2139_v42, %v1065_v39 }
 0x15a   : > { %v910_v44 = vmax.f32 %v878_v40, 0.0  ;;  %v1147_v45 = vmax.f32 %v1066_v41, 0.0 }
 0x15c   : > { %1651 = vmatmul.msk.f32.gmra.mxu2 %vm930_vm3, %v910_v44  ;;  %1666 = vmatmul.msk.f32.gmra.mxu3 %vm930_vm3, %v1147_v45  ;;  %v616_v46 = vpop.f32.mrf.mxu0 }
 0x15d   : > { %v829_v47 = vpop.f32.mrf.mxu1 }
 0x15e   : > { %v830_v48 = vadd.f32 %v829_v47, %v616_v46 }
 0x15f   : > { %v1068_v49 = vpop.f32.mrf.mxu2 }
 0x160   : > { %v879_v50 = vadd.f32 %v2012_v43, %v830_v48  ;;  %v1069_v51 = vadd.f32 %v2139_v42, %v1068_v49 }
 0x162   : > { %v911_v52 = vmax.f32 %v879_v50, 0.0  ;;  %v1148_v53 = vmax.f32 %v1069_v51, 0.0 }
 0x164   : > { %1652 = vmatmul.msk.f32.gmra.mxu2 %vm930_vm3, %v911_v52  ;;  %1667 = vmatmul.msk.f32.gmra.mxu3 %vm930_vm3, %v1148_v53  ;;  %v619_v54 = vpop.f32.mrf.mxu0 }
 0x165   : > { %v832_v55 = vpop.f32.mrf.mxu1 }
 0x166   : > { %v833_v56 = vadd.f32 %v832_v55, %v619_v54 }
 0x167   : > { %v1071_v57 = vpop.f32.mrf.mxu2 }
 0x168   : > { %v880_v58 = vadd.f32 %v2012_v43, %v833_v56  ;;  %v1072_v59 = vadd.f32 %v2139_v42, %v1071_v57 }
 0x16a   : > { %v912_v60 = vmax.f32 %v880_v58, 0.0  ;;  %v1149_v61 = vmax.f32 %v1072_v59, 0.0 }
 0x16c   : > { %1653 = vmatmul.msk.f32.gmra.mxu2 %vm930_vm3, %v912_v60  ;;  %1668 = vmatmul.msk.f32.gmra.mxu3 %vm930_vm3, %v1149_v61  ;;  %v622_v62 = vpop.f32.mrf.mxu0 }
 0x16d   : > { %v835_v63 = vpop.f32.mrf.mxu1 }
 0x16e   : > { %v836_v0 = vadd.f32 %v835_v63, %v622_v62 }
 0x16f   : > { %v1074_v1 = vpop.f32.mrf.mxu2 }
 0x170   : > { %v881_v2 = vadd.f32 %v2012_v43, %v836_v0  ;;  %v1075_v3 = vadd.f32 %v2139_v42, %v1074_v1 }
 0x172   : > { %v913_v4 = vmax.f32 %v881_v2, 0.0  ;;  %v1150_v5 = vmax.f32 %v1075_v3, 0.0 }
 0x174   : > { %1654 = vmatmul.msk.f32.gmra.mxu2 %vm930_vm3, %v913_v4  ;;  %1669 = vmatmul.msk.f32.gmra.mxu3 %vm930_vm3, %v1150_v5  ;;  %v625_v6 = vpop.f32.mrf.mxu0 }
 0x175   : > { %v838_v7 = vpop.f32.mrf.mxu1 }
 0x176   : > { %v839_v8 = vadd.f32 %v838_v7, %v625_v6 }
 0x177   : > { %v1077_v9 = vpop.f32.mrf.mxu2 }
 0x178   : > { %v882_v10 = vadd.f32 %v2012_v43, %v839_v8  ;;  %v1078_v11 = vadd.f32 %v2139_v42, %v1077_v9 }
 0x17a   : > { %v914_v12 = vmax.f32 %v882_v10, 0.0  ;;  %v1151_v13 = vmax.f32 %v1078_v11, 0.0 }
 0x17c   : > { %1655 = vmatmul.msk.f32.gmra.mxu2 %vm930_vm3, %v914_v12  ;;  %1670 = vmatmul.msk.f32.gmra.mxu3 %vm930_vm3, %v1151_v13  ;;  %v628_v14 = vpop.f32.mrf.mxu0 }
 0x17d   : > { %v841_v15 = vpop.f32.mrf.mxu1 }
 0x17e   : > { %v842_v16 = vadd.f32 %v841_v15, %v628_v14 }
 0x17f   : > { %v1080_v17 = vpop.f32.mrf.mxu2 }
 0x180   : > { %v883_v18 = vadd.f32 %v2012_v43, %v842_v16  ;;  %v1081_v19 = vadd.f32 %v2139_v42, %v1080_v17 }
 0x182   : > { %v915_v20 = vmax.f32 %v883_v18, 0.0  ;;  %v1152_v21 = vmax.f32 %v1081_v19, 0.0 }
 0x184   : > { %1656 = vmatmul.msk.f32.gmra.mxu2 %vm930_vm3, %v915_v20  ;;  %1671 = vmatmul.msk.f32.gmra.mxu3 %vm930_vm3, %v1152_v21  ;;  %v631_v22 = vpop.f32.mrf.mxu0 }
 0x185   : > { %v844_v23 = vpop.f32.mrf.mxu1 }
 0x186   : > { %v845_v24 = vadd.f32 %v844_v23, %v631_v22 }
 0x187   : > { %v1083_v25 = vpop.f32.mrf.mxu2 }
 0x188   : > { %v884_v26 = vadd.f32 %v2012_v43, %v845_v24  ;;  %v1084_v27 = vadd.f32 %v2139_v42, %v1083_v25 }
 0x18a   : > { %v916_v28 = vmax.f32 %v884_v26, 0.0  ;;  %v1153_v29 = vmax.f32 %v1084_v27, 0.0 }
 0x18c   : > { %1657 = vmatmul.msk.f32.gmra.mxu2 %vm930_vm3, %v916_v28  ;;  %1672 = vmatmul.msk.f32.gmra.mxu3 %vm930_vm3, %v1153_v29  ;;  %v634_v30 = vpop.f32.mrf.mxu0 }
 0x18d   : > { %v847_v31 = vpop.f32.mrf.mxu1 }
 0x18e   : > { %v848_v32 = vadd.f32 %v847_v31, %v634_v30 }
 0x18f   : > { %v1086_v33 = vpop.f32.mrf.mxu2 }
 0x190   : > { %v885_v34 = vadd.f32 %v2012_v43, %v848_v32  ;;  %v1087_v35 = vadd.f32 %v2139_v42, %v1086_v33  ;;  %v2208_v43 = vld [vmem:[%s2312_s8] ss:$0 sm:$0xff] }
 0x192   : > { %v917_v36 = vmax.f32 %v885_v34, 0.0  ;;  %v1154_v37 = vmax.f32 %v1087_v35, 0.0 }
 0x194   : > { %1658 = vmatmul.msk.f32.gmra.mxu2 %vm930_vm3, %v917_v36  ;;  %1673 = vmatmul.msk.f32.gmra.mxu3 %vm930_vm3, %v1154_v37 }
 0x197   : > { %v1089_v38 = vpop.f32.mrf.mxu2 }
 0x198   : > { %v1090_v39 = vadd.f32 %v2139_v42, %v1089_v38 }
 0x19a   : > { %v1155_v40 = vmax.f32 %v1090_v39, 0.0 }
 0x19c   : > { %1674 = vmatmul.msk.f32.gmra.mxu3 %vm930_vm3, %v1155_v40 }
 0x19f   : > { %v1092_v41 = vpop.f32.mrf.mxu2 }
 0x1a0   : > { %v1093_v44 = vadd.f32 %v2139_v42, %v1092_v41 }
 0x1a2   : > { %v1156_v45 = vmax.f32 %v1093_v44, 0.0 }
 0x1a4   : > { %1675 = vmatmul.msk.f32.gmra.mxu3 %vm930_vm3, %v1156_v45 }
 0x1a7   : > { %v1095_v46 = vpop.f32.mrf.mxu2  ;;  %v1297_v47 = vpop.f32.mrf.mxu3 }
 0x1a8   : > { %v1096_v48 = vadd.f32 %v2139_v42, %v1095_v46  ;;  %v1298_v49 = vadd.f32 %v2208_v43, %v1297_v47 }
 0x1aa   : > { %v1157_v50 = vmax.f32 %v1096_v48, 0.0  ;;  %1393 = vxpose.xlu0.b32.start [1/16] (narrow) %v1298_v49, 8 }
 0x1ac   : > { %1676 = vmatmul.msk.f32.gmra.mxu3 %vm930_vm3, %v1157_v50 }
 0x1af   : > { %v1098_v51 = vpop.f32.mrf.mxu2  ;;  %v1300_v52 = vpop.f32.mrf.mxu3 }
 0x1b0   : > { %v1099_v53 = vadd.f32 %v2139_v42, %v1098_v51  ;;  %v1301_v54 = vadd.f32 %v2208_v43, %v1300_v52 }
 0x1b2   : > { %v1158_v55 = vmax.f32 %v1099_v53, 0.0  ;;  %1394 = vxpose.xlu0.b32.cont [2/16] (narrow) %v1301_v54, 8 }
 0x1b4   : > { %1677 = vmatmul.msk.f32.gmra.mxu3 %vm930_vm3, %v1158_v55 }
 0x1b7   : > { %v1101_v56 = vpop.f32.mrf.mxu2  ;;  %v1303_v57 = vpop.f32.mrf.mxu3 }
 0x1b8   : > { %v1102_v58 = vadd.f32 %v2139_v42, %v1101_v56  ;;  %v1304_v59 = vadd.f32 %v2208_v43, %v1303_v57 }
 0x1ba   : > { %v1159_v60 = vmax.f32 %v1102_v58, 0.0  ;;  %1395 = vxpose.xlu0.b32.cont [3/16] (narrow) %v1304_v59, 8 }
 0x1bc   : > { %1678 = vmatmul.msk.f32.gmra.mxu3 %vm930_vm3, %v1159_v60 }
 0x1bf   : > { %v1104_v61 = vpop.f32.mrf.mxu2  ;;  %v1306_v62 = vpop.f32.mrf.mxu3 }
 0x1c0   : > { %v1105_v63 = vadd.f32 %v2139_v42, %v1104_v61  ;;  %v1307_v0 = vadd.f32 %v2208_v43, %v1306_v62 }
 0x1c2   : > { %v1160_v1 = vmax.f32 %v1105_v63, 0.0  ;;  %1396 = vxpose.xlu0.b32.cont [4/16] (narrow) %v1307_v0, 8 }
 0x1c4   : > { %1679 = vmatmul.msk.f32.gmra.mxu3 %vm930_vm3, %v1160_v1 }
 0x1c7   : > { %v1107_v2 = vpop.f32.mrf.mxu2  ;;  %v1309_v3 = vpop.f32.mrf.mxu3 }
 0x1c8   : > { %v1108_v4 = vadd.f32 %v2139_v42, %v1107_v2  ;;  %v1310_v5 = vadd.f32 %v2208_v43, %v1309_v3 }
 0x1ca   : > { %v1161_v6 = vmax.f32 %v1108_v4, 0.0  ;;  %1397 = vxpose.xlu0.b32.cont [5/16] (narrow) %v1310_v5, 8 }
 0x1cc   : > { %1680 = vmatmul.msk.f32.gmra.mxu3 %vm930_vm3, %v1161_v6 }
 0x1cf   : > { %v1110_v7 = vpop.f32.mrf.mxu2  ;;  %v1312_v8 = vpop.f32.mrf.mxu3 }
 0x1d0   : > { %v1111_v9 = vadd.f32 %v2139_v42, %v1110_v7  ;;  %v1313_v10 = vadd.f32 %v2208_v43, %v1312_v8 }
 0x1d2   : > { %v1162_v11 = vmax.f32 %v1111_v9, 0.0  ;;  %1398 = vxpose.xlu0.b32.cont [6/16] (narrow) %v1313_v10, 8 }
 0x1d4   : > { %1681 = vmatmul.msk.f32.gmra.mxu3 %vm930_vm3, %v1162_v11 }
 0x1d7   : > { %v1113_v12 = vpop.f32.mrf.mxu2  ;;  %v1315_v13 = vpop.f32.mrf.mxu3 }
 0x1d8   : > { %v1114_v14 = vadd.f32 %v2139_v42, %v1113_v12  ;;  %v1316_v15 = vadd.f32 %v2208_v43, %v1315_v13 }
 0x1da   : > { %v1163_v16 = vmax.f32 %v1114_v14, 0.0  ;;  %1399 = vxpose.xlu0.b32.cont [7/16] (narrow) %v1316_v15, 8 }
 0x1dc   : > { %1682 = vmatmul.msk.f32.gmra.mxu3 %vm930_vm3, %v1163_v16 }
 0x1df   : > { %v1116_v17 = vpop.f32.mrf.mxu2  ;;  %v1318_v18 = vpop.f32.mrf.mxu3 }
 0x1e0   : > { %v1117_v19 = vadd.f32 %v2139_v42, %v1116_v17  ;;  %v1319_v20 = vadd.f32 %v2208_v43, %v1318_v18 }
 0x1e2   : > { %v1164_v21 = vmax.f32 %v1117_v19, 0.0  ;;  %1400 = vxpose.xlu0.b32.cont [8/16] (narrow) %v1319_v20, 8 }
 0x1e4   : > { %1683 = vmatmul.msk.f32.gmra.mxu3 %vm930_vm3, %v1164_v21 }
 0x1e7   : > { %v1119_v22 = vpop.f32.mrf.mxu2  ;;  %v1321_v23 = vpop.f32.mrf.mxu3 }
 0x1e8   : > { %v1120_v24 = vadd.f32 %v2139_v42, %v1119_v22  ;;  %v1322_v25 = vadd.f32 %v2208_v43, %v1321_v23 }
 0x1ea   : > { %v1165_v26 = vmax.f32 %v1120_v24, 0.0  ;;  %1401 = vxpose.xlu0.b32.cont [9/16] (narrow) %v1322_v25, 8 }
 0x1ec   : > { %1684 = vmatmul.msk.f32.gmra.mxu3 %vm930_vm3, %v1165_v26 }
 0x1ef   : > { %v1122_v27 = vpop.f32.mrf.mxu2  ;;  %v1324_v28 = vpop.f32.mrf.mxu3 }
 0x1f0   : > { %v1123_v29 = vadd.f32 %v2139_v42, %v1122_v27  ;;  %v1325_v30 = vadd.f32 %v2208_v43, %v1324_v28 }
 0x1f2   : > { %v1166_v31 = vmax.f32 %v1123_v29, 0.0  ;;  %1402 = vxpose.xlu0.b32.cont [10/16] (narrow) %v1325_v30, 8 }
 0x1f4   : > { %1685 = vmatmul.msk.f32.gmra.mxu3 %vm930_vm3, %v1166_v31 }
 0x1f7   : > { %v1125_v32 = vpop.f32.mrf.mxu2  ;;  %v1327_v33 = vpop.f32.mrf.mxu3 }
 0x1f8   : > { %v1126_v34 = vadd.f32 %v2139_v42, %v1125_v32  ;;  %v1328_v35 = vadd.f32 %v2208_v43, %v1327_v33 }
 0x1fa   : > { %v1167_v36 = vmax.f32 %v1126_v34, 0.0  ;;  %1403 = vxpose.xlu0.b32.cont [11/16] (narrow) %v1328_v35, 8 }
 0x1fc   : > { %1686 = vmatmul.msk.f32.gmra.mxu3 %vm930_vm3, %v1167_v36 }
 0x1ff   : > { %v1128_v37 = vpop.f32.mrf.mxu2  ;;  %v1330_v38 = vpop.f32.mrf.mxu3 }
 0x200   : > { %v1129_v39 = vadd.f32 %v2139_v42, %v1128_v37  ;;  %v1331_v40 = vadd.f32 %v2208_v43, %v1330_v38 }
 0x202   : > { %v1168_v41 = vmax.f32 %v1129_v39, 0.0  ;;  %1404 = vxpose.xlu0.b32.cont [12/16] (narrow) %v1331_v40, 8 }
 0x204   : > { %1687 = vmatmul.msk.f32.gmra.mxu3 %vm930_vm3, %v1168_v41 }
 0x207   : > { %v1131_v44 = vpop.f32.mrf.mxu2  ;;  %v1333_v45 = vpop.f32.mrf.mxu3 }
 0x208   : > { %v1132_v46 = vadd.f32 %v2139_v42, %v1131_v44  ;;  %v1334_v47 = vadd.f32 %v2208_v43, %v1333_v45 }
 0x20a   : > { %v1169_v48 = vmax.f32 %v1132_v46, 0.0  ;;  %1405 = vxpose.xlu0.b32.cont [13/16] (narrow) %v1334_v47, 8 }
 0x20c   : > { %1688 = vmatmul.msk.f32.gmra.mxu3 %vm930_vm3, %v1169_v48 }
 0x20f   : > { %v1134_v49 = vpop.f32.mrf.mxu2  ;;  %v1336_v50 = vpop.f32.mrf.mxu3 }
 0x210   : > { %v1135_v51 = vadd.f32 %v2139_v42, %v1134_v49  ;;  %v1337_v52 = vadd.f32 %v2208_v43, %v1336_v50 }
 0x212   : > { %v1170_v53 = vmax.f32 %v1135_v51, 0.0  ;;  %1406 = vxpose.xlu0.b32.cont [14/16] (narrow) %v1337_v52, 8 }
 0x214   : > { %1689 = vmatmul.msk.f32.gmra.mxu3 %vm930_vm3, %v1170_v53 }
 0x217   : > { %v1137_v54 = vpop.f32.mrf.mxu2  ;;  %v1339_v55 = vpop.f32.mrf.mxu3 }
 0x218   : > { %v1138_v56 = vadd.f32 %v2139_v42, %v1137_v54  ;;  %v1340_v57 = vadd.f32 %v2208_v43, %v1339_v55 }
 0x21a   : > { %v1171_v58 = vmax.f32 %v1138_v56, 0.0  ;;  %1407 = vxpose.xlu0.b32.cont [15/16] (narrow) %v1340_v57, 8 }
 0x21c   : > { %1690 = vmatmul.msk.f32.gmra.mxu3 %vm930_vm3, %v1171_v58 }
 0x21f   : > { %v1342_v59 = vpop.f32.mrf.mxu3 }
 0x220   : > { %v1343_v60 = vadd.f32 %v2208_v43, %v1342_v59 }
 0x222   : > { %1408 = vxpose.xlu0.b32.end [16/16] (narrow) %v1343_v60, 8 }
 0x227   : > { %v1345_v61 = vpop.f32.mrf.mxu3 }
 0x228   : > { %v1346_v62 = vadd.f32 %v2208_v43, %v1345_v61 }
 0x22a   : > { %1425 = vxpose.xlu1.b32.start [1/16] (narrow) %v1346_v62, 8 }
 0x22f   : > { %v1348_v63 = vpop.f32.mrf.mxu3 }
 0x230   : > { %v1349_v0 = vadd.f32 %v2208_v43, %v1348_v63 }
 0x232   : > { %1426 = vxpose.xlu1.b32.cont [2/16] (narrow) %v1349_v0, 8 }
 0x237   : > { %v1351_v1 = vpop.f32.mrf.mxu3 }
 0x238   : > { %v1352_v42 = vadd.f32 %v2208_v43, %v1351_v1 }
 0x23a   : > { %1427 = vxpose.xlu1.b32.cont [3/16] (narrow) %v1352_v42, 8 }
 0x23f   : > { %v1354_v2 = vpop.f32.mrf.mxu3 }
 0x240   : > { %v1355_v3 = vadd.f32 %v2208_v43, %v1354_v2 }
 0x242   : > { %1428 = vxpose.xlu1.b32.cont [4/16] (narrow) %v1355_v3, 8 }
 0x247   : > { %v1357_v4 = vpop.f32.mrf.mxu3 }
 0x248   : > { %v1358_v5 = vadd.f32 %v2208_v43, %v1357_v4 }
 0x24a   : > { %1429 = vxpose.xlu1.b32.cont [5/16] (narrow) %v1358_v5, 8 }
 0x24e   : > { %v1409_v29 = vpop.trf.xlu0 }
 0x24f   : > { %v1360_v6 = vpop.f32.mrf.mxu3 }
 0x250   : > { %v1361_v7 = vadd.f32 %v2208_v43, %v1360_v6 }
 0x252   : > { %1430 = vxpose.xlu1.b32.cont [6/16] (narrow) %v1361_v7, 8 }
 0x257   : > { %v1363_v8 = vpop.f32.mrf.mxu3 }
 0x258   : > { %v1364_v9 = vadd.f32 %v2208_v43, %v1363_v8 }
 0x25a   : > { %1431 = vxpose.xlu1.b32.cont [7/16] (narrow) %v1364_v9, 8 }
 0x25f   : > { %v1366_v10 = vpop.f32.mrf.mxu3 }
 0x260   : > { %v1367_v11 = vadd.f32 %v2208_v43, %v1366_v10 }
 0x262   : > { %1432 = vxpose.xlu1.b32.cont [8/16] (narrow) %v1367_v11, 8 }
 0x267   : > { %v1369_v12 = vpop.f32.mrf.mxu3 }
 0x268   : > { %v1370_v13 = vadd.f32 %v2208_v43, %v1369_v12 }
 0x26a   : > { %1433 = vxpose.xlu1.b32.cont [9/16] (narrow) %v1370_v13, 8 }
 0x26f   : > { %v1372_v14 = vpop.f32.mrf.mxu3 }
 0x270   : > { %v1373_v15 = vadd.f32 %v2208_v43, %v1372_v14 }
 0x272   : > { %1434 = vxpose.xlu1.b32.cont [10/16] (narrow) %v1373_v15, 8 }
 0x277   : > { %v1375_v16 = vpop.f32.mrf.mxu3 }
 0x278   : > { %v1376_v17 = vadd.f32 %v2208_v43, %v1375_v16 }
 0x27a   : > { %1435 = vxpose.xlu1.b32.cont [11/16] (narrow) %v1376_v17, 8 }
 0x27f   : > { %v1378_v18 = vpop.f32.mrf.mxu3 }
 0x280   : > { %v1379_v19 = vadd.f32 %v2208_v43, %v1378_v18 }
 0x282   : > { %1436 = vxpose.xlu1.b32.cont [12/16] (narrow) %v1379_v19, 8 }
 0x287   : > { %v1381_v20 = vpop.f32.mrf.mxu3 }
 0x288   : > { %v1382_v21 = vadd.f32 %v2208_v43, %v1381_v20 }
 0x28a   : > { %1437 = vxpose.xlu1.b32.cont [13/16] (narrow) %v1382_v21, 8 }
 0x28f   : > { %v1384_v22 = vpop.f32.mrf.mxu3 }
 0x290   : > { %v1385_v23 = vadd.f32 %v2208_v43, %v1384_v22 }
 0x292   : > { %1438 = vxpose.xlu1.b32.cont [14/16] (narrow) %v1385_v23, 8 }
 0x297   : > { %v1387_v24 = vpop.f32.mrf.mxu3 }
 0x298   : > { %v1388_v25 = vadd.f32 %v2208_v43, %v1387_v24 }
 0x29a   : > { %1439 = vxpose.xlu1.b32.cont [15/16] (narrow) %v1388_v25, 8 }
 0x29f   : > { %v1390_v26 = vpop.f32.mrf.mxu3 }
 0x2a0   : > { %v1391_v27 = vadd.f32 %v2208_v43, %v1390_v26 }
 0x2a2   : > { %1440 = vxpose.xlu1.b32.end [16/16] (narrow) %v1391_v27, 8 }
 0x2ce   : > { %v1441_v28 = vpop.trf.xlu1 }
 0x2cf   : > { %v1459_v30 = vrot.slane %v1441_v28, 6 }
 0x2d1   : > { %v1461_v31 = vsel %vm1460_vm4, %v1409_v29, %v1459_v30 }
 0x2d2   : > { %1463 = vst [vmem:[%s342_s25] sm:$0xf] %v1461_v31 }
 0x2d3   : > { %1766 = shalt.err (!%p1763_p3)
}
 0x2d4   : > { %1697 = dma.vmem_to_hbm [thread:$0]  (%p1891_p5), %s1479_s26, 64, %s1481_s16, %s1465_s22  }
 0x2d5 PF: > { %p1703_p4 = scmp.ge.s32.totalorder %s1801_s12, 2  ;;  %s1492_s29 = sand.u32 1, %s1789_s30  }
 0x2d6   : > { %s1493_s24 = scalar_lea.sflag [#allocation3], %s1492_s29 }
 0x2d7   : > { %p1700_p7 = pnand %p1703_p4, %p1895_p6 }
 0x2d9   : > { %p1701_p8 = pneg %p1700_p7 }
 0x2db   : > { %1784 = dma.done.wait (%p1701_p8), %s1493_s24, 64  }
 0x2dc   : > { %1786 = vsyncadd (%p1701_p8), %s1493_s24, 4294967232  ;;  %p19_p9 = scmp.ge.s32.totalorder %s1878_s15, 4   ;;  %s2316_s30 = smov %s1793_s10 }
 0x2dd   : > { %s2317_s10 = smov %s1797_s11  ;;  %s2318_s11 = smov %s1889_s18 }
 0x2de   : > { %s2319_s12 = smov %s1878_s15  ;;  %21 = sbr.rel (!%p19_p9) target bundleno = 3 (0x3), region = 94 }
 0x2e3   :  { %1499 = vsyncpa [#allocation3], 1 }
 0x2e4   :  { %1501 = vsyncpa [#allocation3 + $0x1], 1 }

</bundles_post_ra>
